<compile_context>
chip_gen: v7x
topology: tpu7x:2x2x1
jax: 0.10.0
libtpu: 0.0.40
codegen_flags: <defaults>
</compile_context>

<pallas_src>
import jax
import jax.numpy as jnp
from jax.experimental import pallas as pl
from jax.experimental.pallas import tpu as pltpu

D_IN, D_H1, D_H2, D_OUT = 10, 20, 15, 5
LANES = 128      # lane-dense working width for hidden/output activations
K0_PAD = 16      # x padded 10 -> 16 cols (sublane-aligned slice of the W slab)


def _mlp_kernel(x_ref, w_ref, b_ref, o_ref):
    """One batch tile.
    x_ref: (TB, 16)   -- cols 10:16 are zero
    w_ref: (3, 128, 128) -- W1/W2/W3 zero-padded, resident across the grid
    b_ref: (8, 128)      -- b1/b2/b3 in rows 0..2, zero-padded, resident
    o_ref: (TB, 128)     -- lane-dense output block (cols 5: sliced off outside)
    """
    x = x_ref[...]                                                # (TB, 16)

    # layer1 + ReLU (contract over 16; weight rows 10:16 are zero)
    h = jnp.dot(x, w_ref[0, :K0_PAD, :],
                preferred_element_type=jnp.float32) + b_ref[0:1, :]
    h = jnp.maximum(h, 0.0)                                       # cols 20: == 0

    # layer2 + ReLU (padded lanes of h and padded rows of W2 are zero)
    h = jnp.dot(h, w_ref[1], preferred_element_type=jnp.float32) + b_ref[1:2, :]
    h = jnp.maximum(h, 0.0)                                       # cols 15: == 0

    # layer3 + Sigmoid; lane-dense unmasked store (cols 5: hold sigmoid(0)=0.5,
    # discarded by the wrapper slice).
    h = jnp.dot(h, w_ref[2], preferred_element_type=jnp.float32) + b_ref[2:3, :]
    o_ref[...] = jax.nn.sigmoid(h).astype(o_ref.dtype)


def pack_params(params):
    """Pack (in,out) weights and (1,out) biases into two zero-padded slabs."""
    w = jnp.zeros((3, LANES, LANES), jnp.float32)
    w = w.at[0, :D_IN, :D_H1].set(params["w1"])
    w = w.at[1, :D_H1, :D_H2].set(params["w2"])
    w = w.at[2, :D_H2, :D_OUT].set(params["w3"])
    b = jnp.zeros((8, LANES), jnp.float32)
    b = b.at[0, :D_H1].set(params["b1"].reshape(-1))
    b = b.at[1, :D_H2].set(params["b2"].reshape(-1))
    b = b.at[2, :D_OUT].set(params["b3"].reshape(-1))
    return w, b


def simple_nn_forward(x, params, *, tb=512):
    """x: (B, 10) float32. params: w1,b1,w2,b2,w3,b3 with w as (in,out), b as (1,out)."""
    B = x.shape[0]
    # Small batches: a single >=8-row tile. Large batches: 512-row tiles
    # (512 f32 rows x 128 lanes x double-buffer fits comfortably in 64 MiB VMEM).
    tb = min(tb, max(8, -(-B // 8) * 8))
    n_tiles = pl.cdiv(B, tb)
    b_pad = n_tiles * tb

    # Pad batch to a multiple of TB and features 10 -> 16 (zeros are inert).
    x_pad = jnp.zeros((b_pad, K0_PAD), jnp.float32).at[:B, :D_IN].set(x)
    w_slab, b_slab = pack_params(params)

    out = pl.pallas_call(
        _mlp_kernel,
        out_shape=jax.ShapeDtypeStruct((b_pad, LANES), jnp.float32),
        grid=(n_tiles,),
        in_specs=[
            pl.BlockSpec((tb, K0_PAD), lambda i: (i, 0)),          # batch-tiled x
            pl.BlockSpec((3, LANES, LANES), lambda i: (0, 0, 0)),  # resident weights
            pl.BlockSpec((8, LANES), lambda i: (0, 0)),            # resident biases
        ],
        out_specs=pl.BlockSpec((tb, LANES), lambda i: (i, 0)),     # lane-dense out
        compiler_params=pltpu.CompilerParams(
            dimension_semantics=("parallel",)),                    # 2 TCs on v7x
    )(x_pad, w_slab, b_slab)
    return out[:B, :D_OUT]


def init_params(key):
    """Deterministic init matching nn.Linear shapes (Kaiming-uniform-ish)."""
    ks = jax.random.split(key, 6)

    def linear(kw, kb, fan_in, fan_out):
        bound = 1.0 / jnp.sqrt(fan_in)
        # PyTorch stores weight as (out, in); we keep it as (in, out) for x @ W.
        w = jax.random.uniform(kw, (fan_in, fan_out), jnp.float32, -bound, bound)
        b = jax.random.uniform(kb, (1, fan_out), jnp.float32, -bound, bound)
        return w, b

    w1, b1 = linear(ks[0], ks[1], D_IN, D_H1)
    w2, b2 = linear(ks[2], ks[3], D_H1, D_H2)
    w3, b3 = linear(ks[4], ks[5], D_H2, D_OUT)
    return {"w1": w1, "b1": b1, "w2": w2, "b2": b2, "w3": w3, "b3": b3}


def _reference(x, p):
    h = jnp.maximum(x @ p["w1"] + p["b1"], 0.0)
    h = jnp.maximum(h @ p["w2"] + p["b2"], 0.0)
    return jax.nn.sigmoid(h @ p["w3"] + p["b3"])


if __name__ == "__main__":
    key = jax.random.PRNGKey(0)
    kx, kp = jax.random.split(key)
    x = jax.random.normal(kx, (8, 10), jnp.float32)   # batch=8, in_features=10
    params = init_params(kp)

    out = simple_nn_forward(x, params)
    out = jax.block_until_ready(out)

    ref = _reference(x, params)
    assert out.shape == (8, 5)
    assert jnp.allclose(out, ref, atol=1e-5, rtol=1e-5)
    print("KERNEL_OK")
</pallas_src>

<mosaic_0001>
module attributes {stable_mosaic.version = 11 : i64} {
  func.func @_mlp_kernel(%arg0: i32, %arg1: memref<8x16xf32, #tpu.memory_space<vmem>>, %arg2: memref<3x128x128xf32, #tpu.memory_space<vmem>>, %arg3: memref<8x128xf32, #tpu.memory_space<vmem>>, %arg4: memref<8x128xf32, #tpu.memory_space<vmem>>) attributes {dimension_semantics = [#tpu.dimension_semantics<parallel>], iteration_bounds = array<i64: 1>, scalar_prefetch = 0 : i64, scratch_operands = 0 : i64, tpu.core_type = #tpu.core_type<tc>, window_params = [{transform_indices = @transform_0, window_bounds = array<i64: 8, 16>}, {pipeline_mode = #tpu.pipeline_mode<synchronous>, transform_indices = @transform_1, window_bounds = array<i64: 3, 128, 128>}, {pipeline_mode = #tpu.pipeline_mode<synchronous>, transform_indices = @transform_2, window_bounds = array<i64: 8, 128>}, {transform_indices = @transform_3, window_bounds = array<i64: 8, 128>}]} {
    %c0 = arith.constant 0 : index
    %c0_0 = arith.constant 0 : index
    %0 = vector.load %arg1[%c0, %c0_0] : memref<8x16xf32, #tpu.memory_space<vmem>>, vector<8x16xf32>
    %c0_1 = arith.constant 0 : index
    %c0_2 = arith.constant 0 : index
    %c0_3 = arith.constant 0 : index
    %1 = vector.load %arg2[%c0_1, %c0_2, %c0_3] : memref<3x128x128xf32, #tpu.memory_space<vmem>>, vector<1x16x128xf32>
    %2 = vector.shape_cast %1 : vector<1x16x128xf32> to vector<16x128xf32>
    %cst = arith.constant dense<0.000000e+00> : vector<8x128xf32>
    %3 = tpu.matmul %0, %2, %cst {dimension_numbers = #tpu.dot_dimension_numbers<[1], [0], [0], [1], [0, 0, 1, 1], [], []>} : vector<8x16xf32>, vector<16x128xf32>, vector<8x128xf32> -> vector<8x128xf32>
    %c0_4 = arith.constant 0 : index
    %c0_5 = arith.constant 0 : index
    %4 = vector.load %arg3[%c0_4, %c0_5] : memref<8x128xf32, #tpu.memory_space<vmem>>, vector<1x128xf32>
    %5 = vector.broadcast %4 : vector<1x128xf32> to vector<8x128xf32>
    %6 = arith.addf %3, %5 : vector<8x128xf32>
    %cst_6 = arith.constant 0.000000e+00 : f32
    %7 = vector.broadcast %cst_6 : f32 to vector<8x128xf32>
    %8 = arith.maximumf %6, %7 : vector<8x128xf32>
    %c1 = arith.constant 1 : index
    %c0_7 = arith.constant 0 : index
    %c0_8 = arith.constant 0 : index
    %9 = vector.load %arg2[%c1, %c0_7, %c0_8] : memref<3x128x128xf32, #tpu.memory_space<vmem>>, vector<1x128x128xf32>
    %10 = vector.shape_cast %9 : vector<1x128x128xf32> to vector<128x128xf32>
    %cst_9 = arith.constant dense<0.000000e+00> : vector<8x128xf32>
    %11 = tpu.matmul %8, %10, %cst_9 {dimension_numbers = #tpu.dot_dimension_numbers<[1], [0], [0], [1], [0, 0, 1, 1], [], []>} : vector<8x128xf32>, vector<128x128xf32>, vector<8x128xf32> -> vector<8x128xf32>
    %c1_10 = arith.constant 1 : index
    %c0_11 = arith.constant 0 : index
    %12 = vector.load %arg3[%c1_10, %c0_11] : memref<8x128xf32, #tpu.memory_space<vmem>>, vector<1x128xf32>
    %13 = vector.broadcast %12 : vector<1x128xf32> to vector<8x128xf32>
    %14 = arith.addf %11, %13 : vector<8x128xf32>
    %cst_12 = arith.constant 0.000000e+00 : f32
    %15 = vector.broadcast %cst_12 : f32 to vector<8x128xf32>
    %16 = arith.maximumf %14, %15 : vector<8x128xf32>
    %c2 = arith.constant 2 : index
    %c0_13 = arith.constant 0 : index
    %c0_14 = arith.constant 0 : index
    %17 = vector.load %arg2[%c2, %c0_13, %c0_14] : memref<3x128x128xf32, #tpu.memory_space<vmem>>, vector<1x128x128xf32>
    %18 = vector.shape_cast %17 : vector<1x128x128xf32> to vector<128x128xf32>
    %cst_15 = arith.constant dense<0.000000e+00> : vector<8x128xf32>
    %19 = tpu.matmul %16, %18, %cst_15 {dimension_numbers = #tpu.dot_dimension_numbers<[1], [0], [0], [1], [0, 0, 1, 1], [], []>} : vector<8x128xf32>, vector<128x128xf32>, vector<8x128xf32> -> vector<8x128xf32>
    %c2_16 = arith.constant 2 : index
    %c0_17 = arith.constant 0 : index
    %20 = vector.load %arg3[%c2_16, %c0_17] : memref<8x128xf32, #tpu.memory_space<vmem>>, vector<1x128xf32>
    %21 = vector.broadcast %20 : vector<1x128xf32> to vector<8x128xf32>
    %22 = arith.addf %19, %21 : vector<8x128xf32>
    %23 = arith.negf %22 : vector<8x128xf32>
    %24 = math.exp %23 : vector<8x128xf32>
    %cst_18 = arith.constant 1.000000e+00 : f32
    %25 = vector.broadcast %cst_18 : f32 to vector<8x128xf32>
    %26 = arith.addf %25, %24 : vector<8x128xf32>
    %27 = arith.divf %25, %26 : vector<8x128xf32>
    %c0_19 = arith.constant 0 : index
    %c0_20 = arith.constant 0 : index
    %28 = vector.load %arg4[%c0_19, %c0_20] : memref<8x128xf32, #tpu.memory_space<vmem>>, vector<8x128xf32>
    tpu.vector_store %arg4[%c0_19, %c0_20], %27 {strides = array<i32>} : memref<8x128xf32, #tpu.memory_space<vmem>>, vector<8x128xf32>,
    return
  }
  func.func @transform_0(%arg0: i32) -> (i32, i32) {
    %c0_i32 = arith.constant 0 : i32
    %c0_i32_0 = arith.constant 0 : i32
    return %arg0, %c0_i32 : i32, i32
  }
  func.func @transform_1(%arg0: i32) -> (i32, i32, i32) {
    %c0_i32 = arith.constant 0 : i32
    %c0_i32_0 = arith.constant 0 : i32
    %c0_i32_1 = arith.constant 0 : i32
    %c0_i32_2 = arith.constant 0 : i32
    return %c0_i32, %c0_i32_0, %c0_i32_1 : i32, i32, i32
  }
  func.func @transform_2(%arg0: i32) -> (i32, i32) {
    %c0_i32 = arith.constant 0 : i32
    %c0_i32_0 = arith.constant 0 : i32
    %c0_i32_1 = arith.constant 0 : i32
    return %c0_i32, %c0_i32_0 : i32, i32
  }
  func.func @transform_3(%arg0: i32) -> (i32, i32) {
    %c0_i32 = arith.constant 0 : i32
    %c0_i32_0 = arith.constant 0 : i32
    return %arg0, %c0_i32 : i32, i32
  }
}

</mosaic_0001>

<bundles_post_ra>
// kernel: tpu_custom_call.1
= control target key start
LH: loop header
LB: loop body
LE: loop exit
PB: predicated region body
PF: predicated region fallthrough
CT: control target
= control target key end

     0   :  { %8 = vsyncpa [#allocation3], 0  ;;  %s717_s0 = inlined_call_operand.hbm [shape: f32[8,16], index: 0, kind: input, shape index: {}]   ;;  %s718_s1 = inlined_call_operand.hbm [shape: f32[3,128,128], index: 1, kind: input, shape index: {}]   ;;  %s719_s2 = inlined_call_operand.hbm [shape: f32[8,128], index: 2, kind: input, shape index: {}]   ;;  %s720_s3 = inlined_call_operand.hbm [shape: f32[8,128], index: 3, kind: output, shape index: {}]  }
   0x1   :  { %9 = vsyncpa [#allocation6], 0 }
   0x2   :  { %10 = vsyncpa [#allocation4], 0  ;;  %s620_s12 = smov [#allocation5]   ;;  %s526_s16 = scalar_lea.hbm %s718_s1, 6144 }
   0x3   :  { %s26_s13 = sshll.u32 %s620_s12, 4  ;;  %p527_p0 = scmp.ne.s32.totalorder %s718_s1, %s526_s16  ;;  %s27_s13 = int_to_ptr.vmem [resolvable:$true] %s26_s13 }
   0x4   :  { %p530_p1 = scmp.lt.u32.totalorder %s526_s16, %s718_s1 }
   0x6   :  { %p532_p2 = pnand %p530_p1, %p527_p0 }
   0x8   :  { %535 = shalt.err (!%p532_p2)
}
   0x9   :  { %s536_s21 = scalar_lea.vmem %s27_s13, 6144  ;;  %p541_p4 = scmp.lt.s32.totalorder %s27_s13, %s27_s13 }
   0xa   :  { %p537_p3 = scmp.ne.s32.totalorder %s27_s13, %s536_s21  ;;  %p542_p5 = scmp.lt.s32.totalorder %s536_s21, %s536_s21 }
   0xc   :  { %p543_p6 = por %p542_p5, %p541_p4 }
   0xe   :  { %p544_p7 = pnand %p543_p6, %p537_p3 }
  0x10   :  { %547 = shalt.err (!%p544_p7)
}
  0x11   :  { %s621_s22 = smov 128   ;;  %s622_s23 = smov 8  }
  0x12   :  { %32 = dma.hbm_to_vmem [thread:$0]  %s718_s1, 6144, %s27_s13, [#allocation6], %s621_s22, %s621_s22, %s622_s23  }
  0x13   :  { %s623_s26 = smov [#allocation2]   ;;  %s624_s28 = smov [#allocation7]  }
  0x14   :  { %s17_s27 = sshll.u32 %s623_s26, 4  ;;  %s39_s29 = sshll.u32 %s624_s28, 4  ;;  %s18_s27 = int_to_ptr.vmem [resolvable:$true] %s17_s27  ;;  %s40_s29 = int_to_ptr.vmem [resolvable:$true] %s39_s29 }
  0x15   :  { %s548_s5 = scalar_lea.hbm %s717_s0, 128 }
  0x16   :  { %p549_p8 = scmp.ne.s32.totalorder %s717_s0, %s548_s5  ;;  %p552_p9 = scmp.lt.u32.totalorder %s548_s5, %s717_s0 }
  0x18   :  { %p554_p10 = pnand %p552_p9, %p549_p8 }
  0x1a   :  { %557 = shalt.err (!%p554_p10)
}
  0x1b   :  { %s558_s1 = scalar_lea.vmem %s18_s27, 128  ;;  %p563_p12 = scmp.lt.s32.totalorder %s18_s27, %s18_s27 }
  0x1c   :  { %p559_p11 = scmp.ne.s32.totalorder %s18_s27, %s558_s1  ;;  %p564_p13 = scmp.lt.s32.totalorder %s558_s1, %s558_s1 }
  0x1e   :  { %p565_p0 = por %p564_p13, %p563_p12 }
  0x20   :  { %p566_p1 = pnand %p565_p0, %p559_p11 }
  0x22   :  { %569 = shalt.err (!%p566_p1)
}
  0x23   :  { %20 = dma.hbm_to_vmem [thread:$0]  %s717_s0, 128, %s18_s27, [#allocation3]  }
  0x24   :  { %s570_s14 = scalar_lea.hbm %s719_s2, 128 }
  0x25   :  { %p571_p2 = scmp.ne.s32.totalorder %s719_s2, %s570_s14  ;;  %p574_p3 = scmp.lt.u32.totalorder %s570_s14, %s719_s2 }
  0x27   :  { %p576_p4 = pnand %p574_p3, %p571_p2 }
  0x29   :  { %579 = shalt.err (!%p576_p4)
}
  0x2a   :  { %s580_s19 = scalar_lea.vmem %s40_s29, 128  ;;  %p585_p6 = scmp.lt.s32.totalorder %s40_s29, %s40_s29 }
  0x2b   :  { %p581_p5 = scmp.ne.s32.totalorder %s40_s29, %s580_s19  ;;  %p586_p7 = scmp.lt.s32.totalorder %s580_s19, %s580_s19 }
  0x2d   :  { %p587_p8 = por %p586_p7, %p585_p6 }
  0x2f   :  { %p588_p9 = pnand %p587_p8, %p581_p5 }
  0x31   :  { %591 = shalt.err (!%p588_p9)
}
  0x32   :  { %42 = dma.hbm_to_vmem [thread:$0]  %s719_s2, 128, %s40_s29, [#allocation6]  }
  0x33   :  { %614 = dma.done.wait [#allocation3], 128  }
  0x34   :  { %615 = vsyncadd [#allocation3], 4294967168 }
  0x35   :  { %616 = dma.done.wait [#allocation6], 6272  }
  0x36   :  { %617 = vsyncadd [#allocation6], 4294961024  ;;  %v625_v0 = vmov 0.0|0.0   ;;  %vm626_vm0 = vmmov 0   ;;  %v627_v1 = vmov 0.0   ;;  %v53_v2 = vld [vmem:[#allocation5] sm:$0xff] }
  0x37   :  { %462 = vmatprep.subr.bf16.mxu0 %v625_v0  ;;  %389 = vmatprep.mubr.msk.f32.mxu0 %vm626_vm0, %v627_v1  ;;  %v54_v3 = vld [vmem:[#allocation5 + $0x8] sm:$0xff]  ;;  %v136_v5 = vld [vmem:[#allocation5 + $0x80] sm:$0xff]  ;;  %v138_v7 = vld [vmem:[#allocation5 + $0x90] sm:$0xff]  ;;  %vm60_vm1 = vcmask 130048   ;;  %s628_s2 = smov [#allocation8]  }
  0x38   :  { %465 = vmatprep.subr.bf16.mxu1 %v625_v0  ;;  %424 = vmatprep.mubr.msk.f32.mxu1 %vm626_vm0, %v627_v1  ;;  %v463_v4 = vpack.c.bf16 %v54_v3, %v53_v2  ;;  %v137_v6 = vld [vmem:[#allocation5 + $0x88] sm:$0xff]  ;;  %v139_v9 = vld [vmem:[#allocation5 + $0x98] sm:$0xff]  ;;  %v140_v12 = vld [vmem:[#allocation5 + $0xa0] sm:$0xff]  ;;  %s333_s21 = sshll.u32 %s628_s2, 4  ;;  %s334_s21 = int_to_ptr.vmem [resolvable:$true] %s333_s21 }
  0x39   :  { %v466_v8 = vpack.c.bf16 %v137_v6, %v136_v5  ;;  %v52_v10 = vld [vmem:[#allocation2] sm:$0xff]  ;;  %v469_v11 = vpack.c.bf16 %v139_v9, %v138_v7  ;;  %v141_v13 = vld [vmem:[#allocation5 + $0xa8] sm:$0xff]  ;;  %v142_v15 = vld [vmem:[#allocation5 + $0xb0] sm:$0xff]  ;;  %s592_s22 = scalar_lea.vmem %s334_s21, 128  ;;  %p597_p11 = scmp.lt.s32.totalorder %s334_s21, %s334_s21 }
  0x3a   :  { %464 = vmatpush3.bf16.msra.mxu0 %v463_v4  ;;  %v472_v14 = vpack.c.bf16 %v141_v13, %v140_v12  ;;  %v143_v16 = vld [vmem:[#allocation5 + $0xb8] sm:$0xff]  ;;  %v144_v18 = vld [vmem:[#allocation5 + $0xc0] sm:$0xff]  ;;  %v145_v19 = vld [vmem:[#allocation5 + $0xc8] sm:$0xff]  ;;  %p593_p10 = scmp.ne.s32.totalorder %s334_s21, %s592_s22  ;;  %p598_p12 = scmp.lt.s32.totalorder %s592_s22, %s592_s22 }
  0x3b   :  { %467 = vmatpush3.bf16.msra.mxu1 %v466_v8  ;;  %489 = vmatprep.subr.bf16.mxu0 %v625_v0  ;;  %v475_v17 = vpack.c.bf16 %v143_v16, %v142_v15  ;;  %v478_v20 = vpack.c.bf16 %v145_v19, %v144_v18  ;;  %v146_v21 = vld [vmem:[#allocation5 + $0xd0] sm:$0xff]  ;;  %v147_v22 = vld [vmem:[#allocation5 + $0xd8] sm:$0xff]  ;;  %v148_v24 = vld [vmem:[#allocation5 + $0xe0] sm:$0xff] }
  0x3c   :  { %468 = vmatprep.subr.bf16.mxu1 %v625_v0  ;;  %v481_v23 = vpack.c.bf16 %v147_v22, %v146_v21  ;;  %v149_v25 = vld [vmem:[#allocation5 + $0xe8] sm:$0xff]  ;;  %v150_v27 = vld [vmem:[#allocation5 + $0xf0] sm:$0xff]  ;;  %v151_v28 = vld [vmem:[#allocation5 + $0xf8] sm:$0xff]  ;;  %p599_p13 = por %p598_p12, %p597_p11 }
  0x3d   :  { %390 = vmatmul.mubr.msk.f32.vlgmr.msra.gmra.mrb[0].mxu0 %vm60_vm1, %v52_v10  ;;  %v484_v26 = vpack.c.bf16 %v149_v25, %v148_v24  ;;  %v487_v29 = vpack.c.bf16 %v151_v28, %v150_v27  ;;  %v229_v30 = vld [vmem:[#allocation5 + $0x100] sm:$0xff]  ;;  %v230_v31 = vld [vmem:[#allocation5 + $0x108] sm:$0xff]  ;;  %v231_v32 = vld [vmem:[#allocation5 + $0x110] sm:$0xff] }
  0x3e   :  { %459 = vmatprep.mubr.msk.f32.mxu0 %vm626_vm0, %v627_v1  ;;  %v490_v33 = vpack.c.bf16 %v230_v31, %v229_v30  ;;  %v232_v34 = vld [vmem:[#allocation5 + $0x118] sm:$0xff]  ;;  %v233_v36 = vld [vmem:[#allocation5 + $0x120] sm:$0xff]  ;;  %v234_v37 = vld [vmem:[#allocation5 + $0x128] sm:$0xff]  ;;  %p600_p0 = pnand %p599_p13, %p593_p10 }
  0x3f   :  { %470 = vmatpush3.bf16.msra.mxu1 %v469_v11  ;;  %v493_v35 = vpack.c.bf16 %v232_v34, %v231_v32  ;;  %v496_v38 = vpack.c.bf16 %v234_v37, %v233_v36  ;;  %v235_v39 = vld [vmem:[#allocation5 + $0x130] sm:$0xff]  ;;  %v236_v40 = vld [vmem:[#allocation5 + $0x138] sm:$0xff]  ;;  %v237_v42 = vld [vmem:[#allocation5 + $0x140] sm:$0xff] }
  0x40   :  { %471 = vmatprep.subr.bf16.mxu1 %v625_v0  ;;  %491 = vmatpush3.bf16.msra.mxu0 %v490_v33  ;;  %v499_v41 = vpack.c.bf16 %v236_v40, %v235_v39  ;;  %v238_v43 = vld [vmem:[#allocation5 + $0x148] sm:$0xff]  ;;  %v239_v45 = vld [vmem:[#allocation5 + $0x150] sm:$0xff]  ;;  %v240_v46 = vld [vmem:[#allocation5 + $0x158] sm:$0xff] }
  0x41   :  { %492 = vmatprep.subr.bf16.mxu0 %v625_v0  ;;  %v502_v44 = vpack.c.bf16 %v238_v43, %v237_v42  ;;  %v505_v47 = vpack.c.bf16 %v240_v46, %v239_v45  ;;  %v241_v48 = vld [vmem:[#allocation5 + $0x160] sm:$0xff]  ;;  %v242_v49 = vld [vmem:[#allocation5 + $0x168] sm:$0xff]  ;;  %v243_v56 = vld [vmem:[#allocation5 + $0x170] sm:$0xff] }
  0x42   :  { %v508_v50 = vpack.c.bf16 %v242_v49, %v241_v48  ;;  %v343_v51 = vld [vmem:[#allocation7] ss:$0 sm:$0xff]  ;;  %v244_v57 = vld [vmem:[#allocation5 + $0x178] sm:$0xff]  ;;  %v345_v59 = vld [vmem:[#allocation7 + $0x1] ss:$0 sm:$0xff] }
  0x43   :  { %473 = vmatpush3.bf16.msra.mxu1 %v472_v14  ;;  %v511_v58 = vpack.c.bf16 %v244_v57, %v243_v56  ;;  %v346_v1 = vld [vmem:[#allocation7 + $0x2] ss:$0 sm:$0xff] }
  0x44   :  { %474 = vmatprep.subr.bf16.mxu1 %v625_v0  ;;  %494 = vmatpush3.bf16.msra.mxu0 %v493_v35 }
  0x45   :  { %495 = vmatprep.subr.bf16.mxu0 %v625_v0 }
  0x47   :  { %476 = vmatpush3.bf16.msra.mxu1 %v475_v17 }
  0x48   :  { %477 = vmatprep.subr.bf16.mxu1 %v625_v0  ;;  %497 = vmatpush3.bf16.msra.mxu0 %v496_v38 }
  0x49   :  { %498 = vmatprep.subr.bf16.mxu0 %v625_v0 }
  0x4b   :  { %479 = vmatpush3.bf16.msra.mxu1 %v478_v20 }
  0x4c   :  { %480 = vmatprep.subr.bf16.mxu1 %v625_v0  ;;  %500 = vmatpush3.bf16.msra.mxu0 %v499_v41 }
  0x4d   :  { %501 = vmatprep.subr.bf16.mxu0 %v625_v0 }
  0x4f   :  { %482 = vmatpush3.bf16.msra.mxu1 %v481_v23 }
  0x50   :  { %483 = vmatprep.subr.bf16.mxu1 %v625_v0  ;;  %503 = vmatpush3.bf16.msra.mxu0 %v502_v44 }
  0x51   :  { %504 = vmatprep.subr.bf16.mxu0 %v625_v0 }
  0x53   :  { %485 = vmatpush3.bf16.msra.mxu1 %v484_v26 }
  0x54   :  { %486 = vmatprep.subr.bf16.mxu1 %v625_v0  ;;  %506 = vmatpush3.bf16.msra.mxu0 %v505_v47 }
  0x55   :  { %507 = vmatprep.subr.bf16.mxu0 %v625_v0 }
  0x57   :  { %488 = vmatpush3.bf16.msra.mxu1 %v487_v29 }
  0x58   :  { %509 = vmatpush3.bf16.msra.mxu0 %v508_v50 }
  0x59   :  { %510 = vmatprep.subr.bf16.mxu0 %v625_v0 }
  0x5c   :  { %512 = vmatpush3.bf16.msra.mxu0 %v511_v58 }
 0x110   :  { %v130_v52 = vpop.f32.mrb[0].mxu0 }
 0x111   :  { %v131_v53 = vadd.f32 %v343_v51, %v130_v52  ;;  %v391_v54 = vpop.f32.mrb[1].mxu0 }
 0x113   :  { %v134_v55 = vmax.f32 %v131_v53, 0.0 }
 0x115   :  { %425 = vmatmul.mubr.f32.vlgmr.msra.gmra.mrb[0].mxu1 %v134_v55 }
 0x1e8   :  { %v223_v60 = vpop.f32.mrb[0].mxu1 }
 0x1e9   :  { %v224_v61 = vadd.f32 %v345_v59, %v223_v60  ;;  %v426_v62 = vpop.f32.mrb[1].mxu1 }
 0x1eb   :  { %v227_v63 = vmax.f32 %v224_v61, 0.0 }
 0x1ed   :  { %460 = vmatmul.mubr.f32.vlgmr.msra.gmra.mrb[2].mxu0 %v227_v63 }
 0x2c0   :  { %v316_v2 = vpop.f32.mrb[2].mxu0 }
 0x2c1   :  { %v317_v3 = vadd.f32 %v346_v1, %v316_v2  ;;  %v461_v0 = vpop.f32.mrb[3].mxu0 }
 0x2c3   :  { %v347_v4 = vmul.f32 -1.442695, %v317_v3 }
 0x2c5   :  { %522 = vpow2.f32 %v347_v4 }
 0x2cf   :  { %v523_v5 = vpop.eup %522 }
 0x2d0   :  { %v323_v6 = vadd.f32 1.0, %v523_v5 }
 0x2d2   :  { %524 = vrcp.f32 %v323_v6 }
 0x2dc   :  { %v525_v7 = vpop.eup %524 }
 0x2dd   :  { %326 = vst [vmem:[#allocation8] sm:$0xff] %v525_v7 }
 0x2de   :  { %603 = shalt.err (!%p600_p0)
}
 0x2df   :  { %s604_s25 = scalar_lea.hbm %s720_s3, 128 }
 0x2e0   :  { %p605_p1 = scmp.ne.s32.totalorder %s720_s3, %s604_s25  ;;  %p608_p2 = scmp.lt.u32.totalorder %s604_s25, %s720_s3 }
 0x2e2   :  { %p610_p3 = pnand %p608_p2, %p605_p1 }
 0x2e4   :  { %613 = shalt.err (!%p610_p3)
}
 0x2e5   :  { %336 = dma.vmem_to_hbm [thread:$0]  %s334_s21, 128, %s720_s3, [#allocation4]  }
 0x2e6   :  { %618 = dma.done.wait [#allocation4], 128  }
 0x2e7   :  { %619 = vsyncadd [#allocation4], 4294967168 }
 0x2e8   :  { %340 = vsyncpa [#allocation3], 1 }
 0x2e9   :  { %341 = vsyncpa [#allocation6], 1 }
 0x2ea   :  { %342 = vsyncpa [#allocation4], 1 }

</bundles_post_ra>
